<compile_context>
chip_gen: v7x
topology: tpu7x:2x2x1
jax: 0.10.0
libtpu: 0.0.40
codegen_flags: <defaults>
</compile_context>

<pallas_src>
import jax
import jax.numpy as jnp
from jax.experimental import pallas as pl
from jax.experimental.pallas import tpu as pltpu


def qnet_kernel(x_ref, w1_ref, b1_ref, w2_ref, b2_ref, o_ref):
    # Transposed formulation: features on sublanes, batch on lanes.
    #   hT = W1 @ xT : (hidden, in1) @ (in1, tb) -> (hidden, tb)
    # Canonical (M,K)x(K,N) contraction -> no implicit operand transpose.
    h = jnp.dot(w1_ref[...], x_ref[...], preferred_element_type=jnp.float32)
    h = jnp.maximum(h + b1_ref[...], 0.0)                  # bias + ReLU (f32 VPU)
    # fc3 (64 -> 1): VPU multiply + sublane (XLU) reduce; result is already a
    # lane-dense [1, tb] row, and the MXU stays free.
    q = jnp.sum(h * w2_ref[...], axis=0, keepdims=True)     # (1, tb)
    o_ref[...] = (q + b2_ref[0, 0]).astype(o_ref.dtype)


def qnetwork_forward(state, action, params, *, tb_max=16384):
    """q = fc3(relu(fc1(concat([state, action], -1)))) via one Pallas kernel.

    state:  [B, state_dim], action: [B, action_dim] (any float dtype)
    params: (w1, b1, w2, b2) in the layout documented in init_params.
    returns [B, 1] float32.
    """
    w1, b1, w2, b2 = params
    B, state_dim = state.shape
    action_dim = action.shape[1]
    in1 = state_dim + action_dim
    hidden = w1.shape[0]

    # ---- layout plumbing (no compute hoisting) ------------------------------
    # Lane-dense activation slab: batch on the 128-lane axis, the 16-wide
    # feature axis on sublanes.  This also fuses torch.cat: the kernel sees one
    # [in1, B] slab and one resident (hidden, in1) weight -> a single matmul.
    x_t = jnp.concatenate([state, action], axis=-1).T        # [in1, B]
    b_pad = ((B + 127) // 128) * 128                          # lane-align batch
    if b_pad != B:
        x_t = jnp.pad(x_t, ((0, 0), (0, b_pad - B)))

    # ---- batch tile ----------------------------------------------------------
    # Per step, double-buffered activation + output blocks cost ~tb*96 B, so
    # even tb=16K is well under every generation's default scoped VMEM while
    # making each step's DMA long enough to hide the fixed per-step overhead.
    tb = min(b_pad, tb_max)
    # Keep >=2 grid steps for medium/large batches so v7x can shard the batch
    # across its two TensorCores (and double buffering stays effective).
    if tb == b_pad and b_pad >= 1024 and b_pad % 256 == 0:
        tb = b_pad // 2
    grid = (pl.cdiv(b_pad, tb),)

    flops = 2 * b_pad * (in1 * hidden + hidden)
    bytes_accessed = int(x_t.size * x_t.dtype.itemsize
                         + 4 * (in1 * hidden + 2 * hidden + 1 + b_pad))

    # TODO(synk): for tiny batches (B << 128) a plain-XLA path avoids kernel
    # dispatch overhead entirely; kept on the Pallas path here (padded to 128).
    q_row = pl.pallas_call(
        qnet_kernel,
        out_shape=jax.ShapeDtypeStruct((1, b_pad), jnp.float32),
        grid=grid,
        in_specs=[
            pl.BlockSpec((in1, tb), lambda i: (0, i)),          # activation tile
            pl.BlockSpec((hidden, in1), lambda i: (0, 0)),      # W1 resident
            pl.BlockSpec((hidden, 1), lambda i: (0, 0)),        # b1 column resident
            pl.BlockSpec((hidden, 1), lambda i: (0, 0)),        # W2 column resident
            pl.BlockSpec(memory_space=pltpu.MemorySpace.SMEM),  # b2 scalar
        ],
        out_specs=pl.BlockSpec((1, tb), lambda i: (0, i)),      # lane-dense Q row
        compiler_params=pltpu.CompilerParams(
            dimension_semantics=("parallel",)),
        cost_estimate=pl.CostEstimate(flops=flops, transcendentals=0,
                                      bytes_accessed=bytes_accessed),
    )(x_t, w1, b1, w2, b2)

    return q_row[0, :B].reshape(B, 1)


def init_params(key, state_dim, action_dim, hidden=64):
    """Synthetic init mimicking nn.Linear's U(-1/sqrt(fan_in), +1/sqrt(fan_in)).

    Kernel layout:
      w1 = fc1.weight            -> (hidden, state_dim + action_dim)
      b1 = fc1.bias[:, None]     -> (hidden, 1)
      w2 = fc3.weight.T          -> (hidden, 1)
      b2 = fc3.bias[None, None]  -> (1, 1)
    """
    k1, k2, k3, k4 = jax.random.split(key, 4)
    in1 = state_dim + action_dim
    bound1 = float(in1) ** -0.5
    bound2 = float(hidden) ** -0.5
    w1 = jax.random.uniform(k1, (hidden, in1), jnp.float32, -bound1, bound1)
    b1 = jax.random.uniform(k2, (hidden, 1), jnp.float32, -bound1, bound1)
    w2 = jax.random.uniform(k3, (hidden, 1), jnp.float32, -bound2, bound2)
    b2 = jax.random.uniform(k4, (1, 1), jnp.float32, -bound2, bound2)
    return (w1, b1, w2, b2)


def reference_forward(state, action, params):
    w1, b1, w2, b2 = params
    x = jnp.concatenate([state, action], axis=-1)            # [B, in1]
    h = jnp.maximum(x @ w1.T + b1[:, 0], 0.0)                 # [B, hidden]
    return h @ w2 + b2[0, 0]                                  # [B, 1]


if __name__ == "__main__":
    key = jax.random.PRNGKey(0)
    k_s, k_a, k_p = jax.random.split(key, 3)

    batch = 8
    state_dim = 12
    action_dim = 4

    state = jax.random.normal(k_s, (batch, state_dim), jnp.float32)
    action = jax.random.normal(k_a, (batch, action_dim), jnp.float32)
    params = init_params(k_p, state_dim, action_dim)

    q = jax.jit(qnetwork_forward)(state, action, params)
    q = jax.block_until_ready(q)

    q_ref = reference_forward(state, action, params)
    assert q.shape == (batch, 1)
    assert jnp.allclose(q, q_ref, atol=1e-4, rtol=1e-4), (
        float(jnp.max(jnp.abs(q - q_ref))))

    print("KERNEL_OK")
</pallas_src>

<mosaic_0001>
module attributes {stable_mosaic.version = 11 : i64} {
  func.func @qnet_kernel(%arg0: i32, %arg1: memref<16x128xf32, #tpu.memory_space<vmem>>, %arg2: memref<64x16xf32, #tpu.memory_space<vmem>>, %arg3: memref<64x1xf32, #tpu.memory_space<vmem>>, %arg4: memref<64x1xf32, #tpu.memory_space<vmem>>, %arg5: memref<1x1xf32, #tpu.memory_space<smem>>, %arg6: memref<1x128xf32, #tpu.memory_space<vmem>>) attributes {dimension_semantics = [#tpu.dimension_semantics<parallel>], iteration_bounds = array<i64: 1>, scalar_prefetch = 0 : i64, scratch_operands = 0 : i64, tpu.core_type = #tpu.core_type<tc>, window_params = [{transform_indices = @transform_0, window_bounds = array<i64: 16, 128>}, {pipeline_mode = #tpu.pipeline_mode<synchronous>, transform_indices = @transform_1, window_bounds = array<i64: 64, 16>}, {pipeline_mode = #tpu.pipeline_mode<synchronous>, transform_indices = @transform_2, window_bounds = array<i64: 64, 1>}, {pipeline_mode = #tpu.pipeline_mode<synchronous>, transform_indices = @transform_3, window_bounds = array<i64: 64, 1>}, {transform_indices = @transform_4, window_bounds = array<i64: 1, 1>}, {transform_indices = @transform_5, window_bounds = array<i64: 1, 128>}]} {
    %c0 = arith.constant 0 : index
    %c0_0 = arith.constant 0 : index
    %0 = vector.load %arg2[%c0, %c0_0] : memref<64x16xf32, #tpu.memory_space<vmem>>, vector<64x16xf32>
    %c0_1 = arith.constant 0 : index
    %c0_2 = arith.constant 0 : index
    %1 = vector.load %arg1[%c0_1, %c0_2] : memref<16x128xf32, #tpu.memory_space<vmem>>, vector<16x128xf32>
    %cst = arith.constant dense<0.000000e+00> : vector<64x128xf32>
    %2 = tpu.matmul %0, %1, %cst {dimension_numbers = #tpu.dot_dimension_numbers<[1], [0], [0], [1], [0, 0, 1, 1], [], []>} : vector<64x16xf32>, vector<16x128xf32>, vector<64x128xf32> -> vector<64x128xf32>
    %c0_3 = arith.constant 0 : index
    %c0_4 = arith.constant 0 : index
    %3 = vector.load %arg3[%c0_3, %c0_4] : memref<64x1xf32, #tpu.memory_space<vmem>>, vector<64x1xf32>
    %4 = vector.broadcast %3 : vector<64x1xf32> to vector<64x128xf32>
    %5 = arith.addf %2, %4 : vector<64x128xf32>
    %cst_5 = arith.constant 0.000000e+00 : f32
    %6 = vector.broadcast %cst_5 : f32 to vector<64x128xf32>
    %7 = arith.maximumf %5, %6 : vector<64x128xf32>
    %c0_6 = arith.constant 0 : index
    %c0_7 = arith.constant 0 : index
    %8 = vector.load %arg4[%c0_6, %c0_7] : memref<64x1xf32, #tpu.memory_space<vmem>>, vector<64x1xf32>
    %9 = vector.broadcast %8 : vector<64x1xf32> to vector<64x128xf32>
    %10 = arith.mulf %7, %9 : vector<64x128xf32>
    %cst_8 = arith.constant dense<0.000000e+00> : vector<128xf32>
    %11 = vector.multi_reduction <add>, %10, %cst_8 [0] : vector<64x128xf32> to vector<128xf32>
    %12 = vector.shape_cast %11 : vector<128xf32> to vector<1x128xf32>
    %c0_9 = arith.constant 0 : index
    %c0_10 = arith.constant 0 : index
    %13 = memref.load %arg5[%c0_9, %c0_10] : memref<1x1xf32, #tpu.memory_space<smem>>
    %14 = vector.broadcast %13 : f32 to vector<1x128xf32>
    %15 = arith.addf %12, %14 : vector<1x128xf32>
    %c0_11 = arith.constant 0 : index
    %c0_12 = arith.constant 0 : index
    %16 = vector.load %arg6[%c0_11, %c0_12] : memref<1x128xf32, #tpu.memory_space<vmem>>, vector<1x128xf32>
    tpu.vector_store %arg6[%c0_11, %c0_12], %15 {strides = array<i32>} : memref<1x128xf32, #tpu.memory_space<vmem>>, vector<1x128xf32>,
    return
  }
  func.func @transform_0(%arg0: i32) -> (i32, i32) {
    %c0_i32 = arith.constant 0 : i32
    %c0_i32_0 = arith.constant 0 : i32
    return %c0_i32, %arg0 : i32, i32
  }
  func.func @transform_1(%arg0: i32) -> (i32, i32) {
    %c0_i32 = arith.constant 0 : i32
    %c0_i32_0 = arith.constant 0 : i32
    %c0_i32_1 = arith.constant 0 : i32
    return %c0_i32, %c0_i32_0 : i32, i32
  }
  func.func @transform_2(%arg0: i32) -> (i32, i32) {
    %c0_i32 = arith.constant 0 : i32
    %c0_i32_0 = arith.constant 0 : i32
    %c0_i32_1 = arith.constant 0 : i32
    return %c0_i32, %c0_i32_0 : i32, i32
  }
  func.func @transform_3(%arg0: i32) -> (i32, i32) {
    %c0_i32 = arith.constant 0 : i32
    %c0_i32_0 = arith.constant 0 : i32
    %c0_i32_1 = arith.constant 0 : i32
    return %c0_i32, %c0_i32_0 : i32, i32
  }
  func.func @transform_4(%arg0: i32) -> (i32, i32) {
    %c0_i32 = arith.constant 0 : i32
    %c0_i32_0 = arith.constant 0 : i32
    %c0_i32_1 = arith.constant 0 : i32
    return %c0_i32, %c0_i32_0 : i32, i32
  }
  func.func @transform_5(%arg0: i32) -> (i32, i32) {
    %c0_i32 = arith.constant 0 : i32
    %c0_i32_0 = arith.constant 0 : i32
    return %c0_i32, %arg0 : i32, i32
  }
}

</mosaic_0001>

<bundles_post_ra>
// kernel: qnetwork_forward.1
= control target key start
LH: loop header
LB: loop body
LE: loop exit
PB: predicated region body
PF: predicated region fallthrough
CT: control target
= control target key end

     0   :  { %vm79_vm0 = vcmask 130048   ;;  %v337_v3 = vmov 0   ;;  %s460_s0 = inlined_call_operand.vmem [shape: f32[16,128], index: 0, kind: input, shape index: {}]   ;;  %s461_s1 = inlined_call_operand.vmem [shape: f32[64,16], index: 1, kind: input, shape index: {}]   ;;  %s462_s2 = inlined_call_operand.vmem [shape: f32[64,1], index: 2, kind: input, shape index: {}]   ;;  %s463_s3 = inlined_call_operand.vmem [shape: f32[64,1], index: 3, kind: input, shape index: {}]   ;;  %s464_s4 = inlined_call_operand.<no memory space> [shape: f32[1,1], index: 4, kind: input, shape index: {}]   ;;  %s465_s5 = inlined_call_operand.vmem [shape: f32[1,128], index: 5, kind: output, shape index: {}]  }
   0x1   :  { %v29_v0 = vld [vmem:[%s460_s0] sm:$0xff]  ;;  %v30_v1 = vld [vmem:[%s460_s0 + $0x8] sm:$0xff]  ;;  %335 = vset.pattern.permute.xlu0 %v337_v3  ;;  %336 = vset.pattern.permute.xlu1 %v337_v3  ;;  %v33_v7 = vld [vmem:[%s462_s2 + $0x10] sm:$0xff] }
   0x2   :  { %v21_v2 = vld [vmem:[%s461_s1] sm:$0xff]  ;;  %v328_v4 = vpack.c.bf16 %v30_v1, %v29_v0  ;;  %v22_v8 = vld [vmem:[%s461_s1 + $0x8] sm:$0xff]  ;;  %v23_v10 = vld [vmem:[%s461_s1 + $0x10] sm:$0xff]  ;;  %51 = vperm.xlu1 %336, %v33_v7  }
   0x3   :  { %316 = vmatprep.mubr.msk.f32.mxu0 %vm79_vm0, %v21_v2  ;;  %v25_v5 = vld [vmem:[%s461_s1 + $0x20] sm:$0xff]  ;;  %v26_v9 = vld [vmem:[%s461_s1 + $0x28] sm:$0xff]  ;;  %v27_v11 = vld [vmem:[%s461_s1 + $0x30] sm:$0xff] }
   0x4   :  { %322 = vmatprep.mubr.msk.f32.mxu1 %vm79_vm0, %v25_v5  ;;  %329 = vmatprep.subr.bf16.mxu0 %v328_v4  ;;  %v31_v6 = vld [vmem:[%s462_s2] sm:$0xff]  ;;  %v32_v12 = vld [vmem:[%s462_s2 + $0x8] sm:$0xff]  ;;  %v34_v13 = vld [vmem:[%s462_s2 + $0x18] sm:$0xff] }
   0x5   :  { %332 = vmatprep.subr.bf16.mxu1 %v328_v4  ;;  %331 = vmatpush3.bf16.msra.mxu0 %v328_v4  ;;  %v24_v14 = vld [vmem:[%s461_s1 + $0x18] sm:$0xff]  ;;  %v217_v16 = vld [vmem:[%s463_s3] sm:$0xff]  ;;  %v218_v17 = vld [vmem:[%s463_s3 + $0x8] sm:$0xff] }
   0x6   :  { %333 = vmatpush3.bf16.msra.mxu1 %v328_v4  ;;  %41 = vperm.xlu0 %335, %v31_v6   ;;  %v28_v15 = vld [vmem:[%s461_s1 + $0x38] sm:$0xff]  ;;  %v35_v18 = vld [vmem:[%s462_s2 + $0x20] sm:$0xff]  ;;  %v219_v19 = vld [vmem:[%s463_s3 + $0x10] sm:$0xff] }
   0x7   :  { %56 = vperm.xlu1 %336, %v34_v13   ;;  %v36_v20 = vld [vmem:[%s462_s2 + $0x28] sm:$0xff]  ;;  %v220_v21 = vld [vmem:[%s463_s3 + $0x18] sm:$0xff]  ;;  %v37_v22 = vld [vmem:[%s462_s2 + $0x30] sm:$0xff] }
   0x8   :  { %317 = vmatmul.mubr.msk.f32.vlgmr.msra.gmra.mrb[0].mxu0 %vm79_vm0, %v22_v8  ;;  %v221_v23 = vld [vmem:[%s463_s3 + $0x20] sm:$0xff]  ;;  %v38_v24 = vld [vmem:[%s462_s2 + $0x38] sm:$0xff]  ;;  %v222_v25 = vld [vmem:[%s463_s3 + $0x28] sm:$0xff] }
   0x9   :  { %323 = vmatmul.mubr.msk.f32.vlgmr.msra.gmra.mrb[0].mxu1 %vm79_vm0, %v26_v9  ;;  %319 = vmatprep.mubr.msk.f32.mxu0 %vm79_vm0, %v23_v10  ;;  %v223_v26 = vld [vmem:[%s463_s3 + $0x30] sm:$0xff]  ;;  %v224_v27 = vld [vmem:[%s463_s3 + $0x38] sm:$0xff] }
   0xa   :  { %325 = vmatprep.mubr.msk.f32.mxu1 %vm79_vm0, %v27_v11  ;;  %46 = vperm.xlu0 %335, %v32_v12  }
   0xb   :  { %232 = vperm.xlu1 %336, %v218_v17  }
   0xc   :  { %320 = vmatmul.mubr.msk.f32.gmra.mrb[2].mxu0 %vm79_vm0, %v24_v14 }
   0xd   :  { %326 = vmatmul.mubr.msk.f32.gmra.mrb[2].mxu1 %vm79_vm0, %v28_v15 }
   0xe   :  { %227 = vperm.xlu0 %335, %v217_v16  }
   0xf   :  { %237 = vperm.xlu1 %336, %v219_v19  }
  0x12   :  { %61 = vperm.xlu0 %335, %v35_v18  }
  0x13   :  { %242 = vperm.xlu1 %336, %v220_v21  }
  0x16   :  { %66 = vperm.xlu0 %335, %v36_v20  }
  0x17   :  { %247 = vperm.xlu1 %336, %v221_v23  }
  0x1a   :  { %71 = vperm.xlu0 %335, %v37_v22  }
  0x1b   :  { %252 = vperm.xlu1 %336, %v222_v25  }
  0x1e   :  { %76 = vperm.xlu0 %335, %v38_v24   ;;  %v287_v24 = vstv %s464_s4 }
  0x1f   :  { %262 = vperm.xlu1 %336, %v224_v27  }
  0x22   :  { %257 = vperm.xlu0 %335, %v223_v26  }
  0x81   :  { %v52_v29 = vpop.permute.xlu1 %51 }
  0x85   :  { %v42_v28 = vpop.permute.xlu0 %41 }
  0x86   :  { %v57_v31 = vpop.permute.xlu1 %56 }
  0x89   :  { %v47_v30 = vpop.permute.xlu0 %46 }
  0x8a   :  { %v233_v33 = vpop.permute.xlu1 %232 }
  0x8d   :  { %v228_v32 = vpop.permute.xlu0 %227 }
  0x8e   :  { %v238_v35 = vpop.permute.xlu1 %237 }
  0x91   :  { %v62_v34 = vpop.permute.xlu0 %61 }
  0x92   :  { %v243_v37 = vpop.permute.xlu1 %242 }
  0x95   :  { %v67_v36 = vpop.permute.xlu0 %66 }
  0x96   :  { %v248_v56 = vpop.permute.xlu1 %247 }
  0x99   :  { %v72_v44 = vpop.permute.xlu0 %71 }
  0x9a   :  { %v253_v5 = vpop.permute.xlu1 %252 }
  0x9d   :  { %v77_v0 = vpop.permute.xlu0 %76 }
  0x9e   :  { %v263_v15 = vpop.permute.xlu1 %262 }
  0xa1   :  { %v258_v12 = vpop.permute.xlu0 %257 }
  0xdb   :  { %v318_v38 = vpop.f32.mrb[0].mxu0 }
  0xdc   :  { %v324_v39 = vpop.f32.mrb[0].mxu1  ;;  %v176_v40 = vadd.f32 %v318_v38, %v47_v30  ;;  %v170_v41 = vpop.f32.mrb[1].mxu0 }
  0xdd   :  { %v190_v42 = vpop.f32.mrb[1].mxu1  ;;  %v171_v43 = vadd.f32 %v170_v41, %v42_v28  ;;  %v196_v57 = vadd.f32 %v324_v39, %v67_v36 }
  0xde   :  { %v210_v45 = vmax.f32 %v176_v40, 0.0  ;;  %v191_v54 = vadd.f32 %v190_v42, %v62_v34 }
  0xdf   :  { %v209_v46 = vmax.f32 %v171_v43, 0.0  ;;  %v321_v47 = vpop.f32.mrb[2].mxu0  ;;  %v214_v1 = vmax.f32 %v196_v57, 0.0 }
  0xe0   :  { %v327_v48 = vpop.f32.mrb[2].mxu1  ;;  %v266_v49 = vmul.f32 %v233_v33, %v210_v45  ;;  %v186_v50 = vadd.f32 %v321_v47, %v57_v31  ;;  %v180_v51 = vpop.f32.mrb[3].mxu0  ;;  %v213_v61 = vmax.f32 %v191_v54, 0.0 }
  0xe1   :  { %v200_v52 = vpop.f32.mrb[3].mxu1  ;;  %v265_v53 = vmul.f32 %v228_v32, %v209_v46  ;;  %v181_v55 = vadd.f32 %v180_v51, %v52_v29  ;;  %v206_v3 = vadd.f32 %v327_v48, %v77_v0  ;;  %v270_v9 = vmul.f32 %v253_v5, %v214_v1 }
  0xe2   :  { %v212_v59 = vmax.f32 %v186_v50, 0.0  ;;  %v201_v63 = vadd.f32 %v200_v52, %v72_v44  ;;  %v269_v6 = vmul.f32 %v248_v56, %v213_v61 }
  0xe3   :  { %v273_v58 = vadd.f32 %v266_v49, %v265_v53  ;;  %v211_v60 = vmax.f32 %v181_v55, 0.0  ;;  %v216_v10 = vmax.f32 %v206_v3, 0.0 }
  0xe4   :  { %v268_v2 = vmul.f32 %v243_v37, %v212_v59  ;;  %v215_v8 = vmax.f32 %v201_v63, 0.0 }
  0xe5   :  { %v267_v62 = vmul.f32 %v238_v35, %v211_v60  ;;  %v272_v16 = vmul.f32 %v263_v15, %v216_v10 }
  0xe6   :  { %v271_v13 = vmul.f32 %v258_v12, %v215_v8 }
  0xe7   :  { %v274_v4 = vadd.f32 %v273_v58, %v267_v62 }
  0xe9   :  { %v275_v7 = vadd.f32 %v274_v4, %v268_v2 }
  0xeb   :  { %v276_v11 = vadd.f32 %v275_v7, %v269_v6 }
  0xed   :  { %v277_v14 = vadd.f32 %v276_v11, %v270_v9 }
  0xef   :  { %v278_v17 = vadd.f32 %v277_v14, %v271_v13 }
  0xf1   :  { %v279_v18 = vadd.f32 %v278_v17, %v272_v16 }
  0xf3   :  { %v280_v19 = vrot.slane %v279_v18, 4 }
  0xf5   :  { %v281_v20 = vadd.f32 %v280_v19, %v279_v18 }
  0xf7   :  { %v282_v21 = vrot.slane %v281_v20, 2 }
  0xf9   :  { %v283_v22 = vadd.f32 %v282_v21, %v281_v20 }
  0xfb   :  { %v284_v23 = vrot.slane %v283_v22, 1 }
  0xfd   :  { %v285_v25 = vadd.f32 %v284_v23, %v283_v22 }
  0xff   :  { %v288_v26 = vadd.f32 %v287_v24, %v285_v25 }
 0x101   :  { %289 = vst [vmem:[%s465_s5] sm:$0x1] %v288_v26 }

</bundles_post_ra>
